<compile_context>
chip_gen: v7x
topology: tpu7x:2x2x1
jax: 0.10.0
libtpu: 0.0.40
codegen_flags: <defaults>
</compile_context>

<pallas_src>
import jax
import jax.numpy as jnp
from jax.experimental import pallas as pl
from jax.experimental.pallas import tpu as pltpu

_H = 128  # padded lane width for every hidden layer


def _round_up(x, m):
    return (x + m - 1) // m * m


def _gamma_mlp_kernel(xs_ref, xsd_ref, xu_ref,
                      w0_ref, b0_ref, w1_ref, b1_ref, w2_ref, b2_ref,
                      w3_ref, b3_ref, w4_ref, b4_ref, w5_ref, b5_ref,
                      o_ref, xcat_ref):
    """Fused 6-layer MLP on one (TB, .) batch tile. Weights stay VMEM-resident."""
    acc = jnp.float32
    cdt = w0_ref.dtype            # compute dtype of the resident weights (f32 / bf16)
    tb = xcat_ref.shape[0]
    ds = xs_ref.shape[1]          # n_state   * traj_len
    du = xu_ref.shape[1]          # m_control * traj_len
    d_in = 2 * ds + du

    # Fused concat: assemble the (TB, d_in_pad) input slab in a VMEM scratch.
    # No extra HBM pass; gives a single lane-dense K for the conv0 matmul.
    xcat_ref[:, :ds] = xs_ref[...].astype(xcat_ref.dtype)
    xcat_ref[:, ds:2 * ds] = xsd_ref[...].astype(xcat_ref.dtype)
    xcat_ref[:, 2 * ds:d_in] = xu_ref[...].astype(xcat_ref.dtype)
    if d_in < xcat_ref.shape[1]:
        # Zero K-padding columns every step (scratch is uninitialized; the
        # matching W0 pad rows are also zero host-side).
        xcat_ref[:, d_in:] = jnp.zeros(
            (tb, xcat_ref.shape[1] - d_in), xcat_ref.dtype)

    # conv0 : single full-K MXU matmul (+ bias, ReLU), f32 accumulation.
    h = jnp.dot(xcat_ref[...].astype(cdt), w0_ref[...],
                preferred_element_type=acc) + b0_ref[...].astype(acc)
    h = jnp.maximum(h, 0.0)

    # conv1, conv2, fc0, fc1 : Linear(128 -> 128 padded) + ReLU.
    for w_ref, b_ref in ((w1_ref, b1_ref), (w2_ref, b2_ref),
                         (w3_ref, b3_ref), (w4_ref, b4_ref)):
        h = jnp.dot(h.astype(cdt), w_ref[...],
                    preferred_element_type=acc) + b_ref[...].astype(acc)
        h = jnp.maximum(h, 0.0)

    # fc2 + tanh: only the true m_control columns are stored to HBM.
    y = jnp.dot(h.astype(cdt), w5_ref[...],
                preferred_element_type=acc) + b5_ref[...].astype(acc)
    m_out = o_ref.shape[1]
    o_ref[...] = jnp.tanh(y[:, :m_out]).astype(o_ref.dtype)


def pack_params(raw, n_state, m_control, traj_len, dtype=jnp.float32):
    """Permute W_conv0 rows into the grouped [state | state_diff | u] order,
    zero-pad every width to 128 lanes (and K to a multiple of 128), and cast
    once to the compute dtype.

    `raw` holds the logical nn.Linear parameters stored as (in, out):
      w_conv0 (D_in,64), w_conv1 (64,128), w_conv2 (128,128),
      w_fc0 (128,128),   w_fc1 (128,64),   w_fc2 (64,m_control)  + biases.
    Padding is numerically exact: padded columns get zero weight & bias, so
    ReLU keeps them at 0 and padded input rows of the next layer see zeros.
    """
    width = 2 * n_state + m_control
    d_in = width * traj_len
    d_in_pad = _round_up(d_in, _H)
    w0 = raw["w_conv0"]
    assert w0.shape[0] == d_in

    # Interleaved cat([state, state_diff, u]) row index -> grouped row order.
    rows = jnp.arange(d_in).reshape(traj_len, width)
    perm = jnp.concatenate([rows[:, :n_state].reshape(-1),
                            rows[:, n_state:2 * n_state].reshape(-1),
                            rows[:, 2 * n_state:].reshape(-1)])
    w0g = w0[perm]

    def pad2(w, rows_to, cols_to=_H):
        return jnp.pad(w, ((0, rows_to - w.shape[0]),
                           (0, cols_to - w.shape[1]))).astype(dtype)

    def pad_b(b):
        return jnp.pad(b, (0, _H - b.shape[0])).reshape(1, _H).astype(dtype)

    return {
        "w0": pad2(w0g, d_in_pad), "b0": pad_b(raw["b_conv0"]),
        "w1": pad2(raw["w_conv1"], _H), "b1": pad_b(raw["b_conv1"]),
        "w2": pad2(raw["w_conv2"], _H), "b2": pad_b(raw["b_conv2"]),
        "w3": pad2(raw["w_fc0"], _H), "b3": pad_b(raw["b_fc0"]),
        "w4": pad2(raw["w_fc1"], _H), "b4": pad_b(raw["b_fc1"]),
        "w5": pad2(raw["w_fc2"], _H), "b5": pad_b(raw["b_fc2"]),
    }


def gamma_linear_forward(state, state_diff, u, packed, m_control, *,
                         block_bs=4096):
    """Forward pass of Gamma_linear.

    args:
        state, state_diff: (bs, traj_len, n_state)
        u:                 (bs, traj_len, m_control)
        packed:            output of pack_params (f32 or bf16 weights)
        m_control:         true output width
        block_bs:          max batch-tile rows per grid step (multiple of 8 used)
    returns:
        gamma: (bs, m_control) float32
    """
    # TODO(synk): preprocess_func (None by default in the module) is not applied.
    bs = state.shape[0]

    # Row-major reshapes only (free layout no-ops); no concat, no dtype cast.
    xs = state.reshape(bs, -1)
    xsd = state_diff.reshape(bs, -1)
    xu = u.reshape(bs, -1)

    # Batch tile: always a multiple of 8; ~6 MB VMEM footprint at TB=4096 (well
    # under the 16/32 MiB scoped defaults); for large batches cap at ceil(bs/2)
    # so the "parallel" grid has >= 2 steps and both v7x TensorCores are used.
    tb = _round_up(min(int(block_bs), bs), 8)
    half = _round_up((bs + 1) // 2, 8)
    if half >= 256:
        tb = min(tb, half)
    bs_p = _round_up(bs, tb)
    if bs_p != bs:
        pad = ((0, bs_p - bs), (0, 0))
        xs, xsd, xu = (jnp.pad(a, pad) for a in (xs, xsd, xu))

    w_keys = ("w0", "b0", "w1", "b1", "w2", "b2",
              "w3", "b3", "w4", "b4", "w5", "b5")
    ws = [packed[k] for k in w_keys]
    d_in_pad = packed["w0"].shape[0]

    def x_spec(a):  # batch-tiled activations
        return pl.BlockSpec((tb, a.shape[1]), lambda i: (i, 0))

    def w_spec(a):  # VMEM-resident weights: same block every grid step
        return pl.BlockSpec(a.shape, lambda i: (0, 0))

    out = pl.pallas_call(
        _gamma_mlp_kernel,
        out_shape=jax.ShapeDtypeStruct((bs_p, m_control), jnp.float32),
        grid=(bs_p // tb,),
        in_specs=[x_spec(xs), x_spec(xsd), x_spec(xu)] + [w_spec(w) for w in ws],
        out_specs=pl.BlockSpec((tb, m_control), lambda i: (i, 0)),
        scratch_shapes=[pltpu.VMEM((tb, d_in_pad), jnp.float32)],
        compiler_params=pltpu.CompilerParams(
            dimension_semantics=("parallel",),   # megacore sharding on v7x
        ),
    )(xs, xsd, xu, *ws)

    return out[:bs]


def init_params(key, n_state, m_control, traj_len):
    """Deterministic synthetic parameters (nn.Linear-like uniform fan-in init),
    stored (in_features, out_features)."""
    d_in = (2 * n_state + m_control) * traj_len
    dims = [("conv0", d_in, 64), ("conv1", 64, 128), ("conv2", 128, 128),
            ("fc0", 128, 128), ("fc1", 128, 64), ("fc2", 64, m_control)]
    raw = {}
    for name, fan_in, fan_out in dims:
        key, kw, kb = jax.random.split(key, 3)
        bound = 1.0 / (fan_in ** 0.5)
        raw[f"w_{name}"] = jax.random.uniform(
            kw, (fan_in, fan_out), jnp.float32, -bound, bound)
        raw[f"b_{name}"] = jax.random.uniform(
            kb, (fan_out,), jnp.float32, -bound, bound)
    return raw


def _reference(state, state_diff, u, raw):
    x = jnp.concatenate([state, state_diff, u], axis=-1)
    x = x.reshape(x.shape[0], -1)
    x = jnp.maximum(x @ raw["w_conv0"] + raw["b_conv0"], 0.0)
    x = jnp.maximum(x @ raw["w_conv1"] + raw["b_conv1"], 0.0)
    x = jnp.maximum(x @ raw["w_conv2"] + raw["b_conv2"], 0.0)
    x = jnp.maximum(x @ raw["w_fc0"] + raw["b_fc0"], 0.0)
    x = jnp.maximum(x @ raw["w_fc1"] + raw["b_fc1"], 0.0)
    return jnp.tanh(x @ raw["w_fc2"] + raw["b_fc2"])


if __name__ == "__main__":
    # Small shapes consistent with the module's forward signature.
    n_state, m_control, traj_len = 4, 2, 8

    key = jax.random.PRNGKey(0)
    k_params, k1, k2, k3, k4, k5, k6 = jax.random.split(key, 7)

    raw = init_params(k_params, n_state, m_control, traj_len)
    packed = pack_params(raw, n_state, m_control, traj_len)           # f32 weights

    fwd = jax.jit(gamma_linear_forward, static_argnames=("m_control", "block_bs"))

    # --- small batch, single grid step -------------------------------------
    bs = 8
    state = jax.random.normal(k1, (bs, traj_len, n_state), jnp.float32)
    state_diff = jax.random.normal(k2, (bs, traj_len, n_state), jnp.float32)
    u = jax.random.normal(k3, (bs, traj_len, m_control), jnp.float32)

    gamma = jax.block_until_ready(fwd(state, state_diff, u, packed,
                                      m_control=m_control))
    ref = jax.block_until_ready(_reference(state, state_diff, u, raw))
    assert gamma.shape == (bs, m_control)
    assert jnp.allclose(gamma, ref, atol=1e-4, rtol=1e-4), float(
        jnp.max(jnp.abs(gamma - ref)))

    # --- multi-step grid + batch-padding path (bs=300, tb=128 -> grid=3) ----
    bs2 = 300
    state2 = jax.random.normal(k4, (bs2, traj_len, n_state), jnp.float32)
    sd2 = jax.random.normal(k5, (bs2, traj_len, n_state), jnp.float32)
    u2 = jax.random.normal(k6, (bs2, traj_len, m_control), jnp.float32)

    gamma2 = jax.block_until_ready(fwd(state2, sd2, u2, packed,
                                       m_control=m_control, block_bs=128))
    ref2 = jax.block_until_ready(_reference(state2, sd2, u2, raw))
    assert gamma2.shape == (bs2, m_control)
    assert jnp.allclose(gamma2, ref2, atol=1e-4, rtol=1e-4), float(
        jnp.max(jnp.abs(gamma2 - ref2)))

    # --- bf16-weight path (memory-bound v5e/v6e); f32 accumulation ----------
    packed_bf16 = pack_params(raw, n_state, m_control, traj_len,
                              dtype=jnp.bfloat16)
    gamma_bf = jax.block_until_ready(fwd(state, state_diff, u, packed_bf16,
                                         m_control=m_control))
    assert jnp.allclose(gamma_bf, ref, atol=1e-1, rtol=0), float(
        jnp.max(jnp.abs(gamma_bf - ref)))

    print("KERNEL_OK")
</pallas_src>

<mosaic_0001>
module attributes {stable_mosaic.version = 11 : i64} {
  func.func @_gamma_mlp_kernel(%arg0: i32, %arg1: memref<8x32xf32, #tpu.memory_space<vmem>>, %arg2: memref<8x32xf32, #tpu.memory_space<vmem>>, %arg3: memref<8x16xf32, #tpu.memory_space<vmem>>, %arg4: memref<128x128xf32, #tpu.memory_space<vmem>>, %arg5: memref<1x128xf32, #tpu.memory_space<vmem>>, %arg6: memref<128x128xf32, #tpu.memory_space<vmem>>, %arg7: memref<1x128xf32, #tpu.memory_space<vmem>>, %arg8: memref<128x128xf32, #tpu.memory_space<vmem>>, %arg9: memref<1x128xf32, #tpu.memory_space<vmem>>, %arg10: memref<128x128xf32, #tpu.memory_space<vmem>>, %arg11: memref<1x128xf32, #tpu.memory_space<vmem>>, %arg12: memref<128x128xf32, #tpu.memory_space<vmem>>, %arg13: memref<1x128xf32, #tpu.memory_space<vmem>>, %arg14: memref<128x128xf32, #tpu.memory_space<vmem>>, %arg15: memref<1x128xf32, #tpu.memory_space<vmem>>, %arg16: memref<8x2xf32, #tpu.memory_space<vmem>>, %arg17: memref<8x128xf32, #tpu.memory_space<vmem>>) attributes {dimension_semantics = [#tpu.dimension_semantics<parallel>], iteration_bounds = array<i64: 1>, scalar_prefetch = 0 : i64, scratch_operands = 1 : i64, tpu.core_type = #tpu.core_type<tc>, window_params = [{transform_indices = @transform_0, window_bounds = array<i64: 8, 32>}, {transform_indices = @transform_1, window_bounds = array<i64: 8, 32>}, {transform_indices = @transform_2, window_bounds = array<i64: 8, 16>}, {pipeline_mode = #tpu.pipeline_mode<synchronous>, transform_indices = @transform_3, window_bounds = array<i64: 128, 128>}, {pipeline_mode = #tpu.pipeline_mode<synchronous>, transform_indices = @transform_4, window_bounds = array<i64: 1, 128>}, {pipeline_mode = #tpu.pipeline_mode<synchronous>, transform_indices = @transform_5, window_bounds = array<i64: 128, 128>}, {pipeline_mode = #tpu.pipeline_mode<synchronous>, transform_indices = @transform_6, window_bounds = array<i64: 1, 128>}, {pipeline_mode = #tpu.pipeline_mode<synchronous>, transform_indices = @transform_7, window_bounds = array<i64: 128, 128>}, {pipeline_mode = #tpu.pipeline_mode<synchronous>, transform_indices = @transform_8, window_bounds = array<i64: 1, 128>}, {pipeline_mode = #tpu.pipeline_mode<synchronous>, transform_indices = @transform_9, window_bounds = array<i64: 128, 128>}, {pipeline_mode = #tpu.pipeline_mode<synchronous>, transform_indices = @transform_10, window_bounds = array<i64: 1, 128>}, {pipeline_mode = #tpu.pipeline_mode<synchronous>, transform_indices = @transform_11, window_bounds = array<i64: 128, 128>}, {pipeline_mode = #tpu.pipeline_mode<synchronous>, transform_indices = @transform_12, window_bounds = array<i64: 1, 128>}, {pipeline_mode = #tpu.pipeline_mode<synchronous>, transform_indices = @transform_13, window_bounds = array<i64: 128, 128>}, {pipeline_mode = #tpu.pipeline_mode<synchronous>, transform_indices = @transform_14, window_bounds = array<i64: 1, 128>}, {transform_indices = @transform_15, window_bounds = array<i64: 8, 2>}]} {
    %c0 = arith.constant 0 : index
    %c0_0 = arith.constant 0 : index
    %0 = vector.load %arg1[%c0, %c0_0] : memref<8x32xf32, #tpu.memory_space<vmem>>, vector<8x32xf32>
    %c0_1 = arith.constant 0 : index
    %c0_2 = arith.constant 0 : index
    %1 = vector.load %arg17[%c0_1, %c0_2] : memref<8x128xf32, #tpu.memory_space<vmem>>, vector<8x32xf32>
    tpu.vector_store %arg17[%c0_1, %c0_2], %0 {strides = array<i32>} : memref<8x128xf32, #tpu.memory_space<vmem>>, vector<8x32xf32>,
    %c0_3 = arith.constant 0 : index
    %c0_4 = arith.constant 0 : index
    %2 = vector.load %arg2[%c0_3, %c0_4] : memref<8x32xf32, #tpu.memory_space<vmem>>, vector<8x32xf32>
    %c0_5 = arith.constant 0 : index
    %c32 = arith.constant 32 : index
    %3 = vector.load %arg17[%c0_5, %c32] : memref<8x128xf32, #tpu.memory_space<vmem>>, vector<8x32xf32>
    tpu.vector_store %arg17[%c0_5, %c32], %2 {strides = array<i32>} : memref<8x128xf32, #tpu.memory_space<vmem>>, vector<8x32xf32>,
    %c0_6 = arith.constant 0 : index
    %c0_7 = arith.constant 0 : index
    %4 = vector.load %arg3[%c0_6, %c0_7] : memref<8x16xf32, #tpu.memory_space<vmem>>, vector<8x16xf32>
    %c0_8 = arith.constant 0 : index
    %c64 = arith.constant 64 : index
    %5 = vector.load %arg17[%c0_8, %c64] : memref<8x128xf32, #tpu.memory_space<vmem>>, vector<8x16xf32>
    tpu.vector_store %arg17[%c0_8, %c64], %4 {strides = array<i32>} : memref<8x128xf32, #tpu.memory_space<vmem>>, vector<8x16xf32>,
    %cst = arith.constant 0.000000e+00 : f32
    %6 = vector.broadcast %cst : f32 to vector<8x48xf32>
    %c0_9 = arith.constant 0 : index
    %c80 = arith.constant 80 : index
    %7 = vector.load %arg17[%c0_9, %c80] : memref<8x128xf32, #tpu.memory_space<vmem>>, vector<8x48xf32>
    tpu.vector_store %arg17[%c0_9, %c80], %6 {strides = array<i32>} : memref<8x128xf32, #tpu.memory_space<vmem>>, vector<8x48xf32>,
    %c0_10 = arith.constant 0 : index
    %c0_11 = arith.constant 0 : index
    %8 = vector.load %arg17[%c0_10, %c0_11] : memref<8x128xf32, #tpu.memory_space<vmem>>, vector<8x128xf32>
    %c0_12 = arith.constant 0 : index
    %c0_13 = arith.constant 0 : index
    %9 = vector.load %arg4[%c0_12, %c0_13] : memref<128x128xf32, #tpu.memory_space<vmem>>, vector<128x128xf32>
    %cst_14 = arith.constant dense<0.000000e+00> : vector<8x128xf32>
    %10 = tpu.matmul %8, %9, %cst_14 {dimension_numbers = #tpu.dot_dimension_numbers<[1], [0], [0], [1], [0, 0, 1, 1], [], []>} : vector<8x128xf32>, vector<128x128xf32>, vector<8x128xf32> -> vector<8x128xf32>
    %c0_15 = arith.constant 0 : index
    %c0_16 = arith.constant 0 : index
    %11 = vector.load %arg5[%c0_15, %c0_16] : memref<1x128xf32, #tpu.memory_space<vmem>>, vector<1x128xf32>
    %12 = vector.broadcast %11 : vector<1x128xf32> to vector<8x128xf32>
    %13 = arith.addf %10, %12 : vector<8x128xf32>
    %cst_17 = arith.constant 0.000000e+00 : f32
    %14 = vector.broadcast %cst_17 : f32 to vector<8x128xf32>
    %15 = arith.maximumf %13, %14 : vector<8x128xf32>
    %c0_18 = arith.constant 0 : index
    %c0_19 = arith.constant 0 : index
    %16 = vector.load %arg6[%c0_18, %c0_19] : memref<128x128xf32, #tpu.memory_space<vmem>>, vector<128x128xf32>
    %cst_20 = arith.constant dense<0.000000e+00> : vector<8x128xf32>
    %17 = tpu.matmul %15, %16, %cst_20 {dimension_numbers = #tpu.dot_dimension_numbers<[1], [0], [0], [1], [0, 0, 1, 1], [], []>} : vector<8x128xf32>, vector<128x128xf32>, vector<8x128xf32> -> vector<8x128xf32>
    %c0_21 = arith.constant 0 : index
    %c0_22 = arith.constant 0 : index
    %18 = vector.load %arg7[%c0_21, %c0_22] : memref<1x128xf32, #tpu.memory_space<vmem>>, vector<1x128xf32>
    %19 = vector.broadcast %18 : vector<1x128xf32> to vector<8x128xf32>
    %20 = arith.addf %17, %19 : vector<8x128xf32>
    %cst_23 = arith.constant 0.000000e+00 : f32
    %21 = vector.broadcast %cst_23 : f32 to vector<8x128xf32>
    %22 = arith.maximumf %20, %21 : vector<8x128xf32>
    %c0_24 = arith.constant 0 : index
    %c0_25 = arith.constant 0 : index
    %23 = vector.load %arg8[%c0_24, %c0_25] : memref<128x128xf32, #tpu.memory_space<vmem>>, vector<128x128xf32>
    %cst_26 = arith.constant dense<0.000000e+00> : vector<8x128xf32>
    %24 = tpu.matmul %22, %23, %cst_26 {dimension_numbers = #tpu.dot_dimension_numbers<[1], [0], [0], [1], [0, 0, 1, 1], [], []>} : vector<8x128xf32>, vector<128x128xf32>, vector<8x128xf32> -> vector<8x128xf32>
    %c0_27 = arith.constant 0 : index
    %c0_28 = arith.constant 0 : index
    %25 = vector.load %arg9[%c0_27, %c0_28] : memref<1x128xf32, #tpu.memory_space<vmem>>, vector<1x128xf32>
    %26 = vector.broadcast %25 : vector<1x128xf32> to vector<8x128xf32>
    %27 = arith.addf %24, %26 : vector<8x128xf32>
    %cst_29 = arith.constant 0.000000e+00 : f32
    %28 = vector.broadcast %cst_29 : f32 to vector<8x128xf32>
    %29 = arith.maximumf %27, %28 : vector<8x128xf32>
    %c0_30 = arith.constant 0 : index
    %c0_31 = arith.constant 0 : index
    %30 = vector.load %arg10[%c0_30, %c0_31] : memref<128x128xf32, #tpu.memory_space<vmem>>, vector<128x128xf32>
    %cst_32 = arith.constant dense<0.000000e+00> : vector<8x128xf32>
    %31 = tpu.matmul %29, %30, %cst_32 {dimension_numbers = #tpu.dot_dimension_numbers<[1], [0], [0], [1], [0, 0, 1, 1], [], []>} : vector<8x128xf32>, vector<128x128xf32>, vector<8x128xf32> -> vector<8x128xf32>
    %c0_33 = arith.constant 0 : index
    %c0_34 = arith.constant 0 : index
    %32 = vector.load %arg11[%c0_33, %c0_34] : memref<1x128xf32, #tpu.memory_space<vmem>>, vector<1x128xf32>
    %33 = vector.broadcast %32 : vector<1x128xf32> to vector<8x128xf32>
    %34 = arith.addf %31, %33 : vector<8x128xf32>
    %cst_35 = arith.constant 0.000000e+00 : f32
    %35 = vector.broadcast %cst_35 : f32 to vector<8x128xf32>
    %36 = arith.maximumf %34, %35 : vector<8x128xf32>
    %c0_36 = arith.constant 0 : index
    %c0_37 = arith.constant 0 : index
    %37 = vector.load %arg12[%c0_36, %c0_37] : memref<128x128xf32, #tpu.memory_space<vmem>>, vector<128x128xf32>
    %cst_38 = arith.constant dense<0.000000e+00> : vector<8x128xf32>
    %38 = tpu.matmul %36, %37, %cst_38 {dimension_numbers = #tpu.dot_dimension_numbers<[1], [0], [0], [1], [0, 0, 1, 1], [], []>} : vector<8x128xf32>, vector<128x128xf32>, vector<8x128xf32> -> vector<8x128xf32>
    %c0_39 = arith.constant 0 : index
    %c0_40 = arith.constant 0 : index
    %39 = vector.load %arg13[%c0_39, %c0_40] : memref<1x128xf32, #tpu.memory_space<vmem>>, vector<1x128xf32>
    %40 = vector.broadcast %39 : vector<1x128xf32> to vector<8x128xf32>
    %41 = arith.addf %38, %40 : vector<8x128xf32>
    %cst_41 = arith.constant 0.000000e+00 : f32
    %42 = vector.broadcast %cst_41 : f32 to vector<8x128xf32>
    %43 = arith.maximumf %41, %42 : vector<8x128xf32>
    %c0_42 = arith.constant 0 : index
    %c0_43 = arith.constant 0 : index
    %44 = vector.load %arg14[%c0_42, %c0_43] : memref<128x128xf32, #tpu.memory_space<vmem>>, vector<128x128xf32>
    %cst_44 = arith.constant dense<0.000000e+00> : vector<8x128xf32>
    %45 = tpu.matmul %43, %44, %cst_44 {dimension_numbers = #tpu.dot_dimension_numbers<[1], [0], [0], [1], [0, 0, 1, 1], [], []>} : vector<8x128xf32>, vector<128x128xf32>, vector<8x128xf32> -> vector<8x128xf32>
    %c0_45 = arith.constant 0 : index
    %c0_46 = arith.constant 0 : index
    %46 = vector.load %arg15[%c0_45, %c0_46] : memref<1x128xf32, #tpu.memory_space<vmem>>, vector<1x128xf32>
    %47 = vector.broadcast %46 : vector<1x128xf32> to vector<8x128xf32>
    %48 = arith.addf %45, %47 : vector<8x128xf32>
    %49 = vector.extract_strided_slice %48 {offsets = [0, 0], sizes = [8, 2], strides = [1, 1]} : vector<8x128xf32> to vector<8x2xf32>
    %50 = math.tanh %49 : vector<8x2xf32>
    %c0_47 = arith.constant 0 : index
    %c0_48 = arith.constant 0 : index
    %51 = vector.load %arg16[%c0_47, %c0_48] : memref<8x2xf32, #tpu.memory_space<vmem>>, vector<8x2xf32>
    tpu.vector_store %arg16[%c0_47, %c0_48], %50 {strides = array<i32>} : memref<8x2xf32, #tpu.memory_space<vmem>>, vector<8x2xf32>,
    return
  }
  func.func @transform_0(%arg0: i32) -> (i32, i32) {
    %c0_i32 = arith.constant 0 : i32
    %c0_i32_0 = arith.constant 0 : i32
    return %arg0, %c0_i32 : i32, i32
  }
  func.func @transform_1(%arg0: i32) -> (i32, i32) {
    %c0_i32 = arith.constant 0 : i32
    %c0_i32_0 = arith.constant 0 : i32
    return %arg0, %c0_i32 : i32, i32
  }
  func.func @transform_2(%arg0: i32) -> (i32, i32) {
    %c0_i32 = arith.constant 0 : i32
    %c0_i32_0 = arith.constant 0 : i32
    return %arg0, %c0_i32 : i32, i32
  }
  func.func @transform_3(%arg0: i32) -> (i32, i32) {
    %c0_i32 = arith.constant 0 : i32
    %c0_i32_0 = arith.constant 0 : i32
    %c0_i32_1 = arith.constant 0 : i32
    return %c0_i32, %c0_i32_0 : i32, i32
  }
  func.func @transform_4(%arg0: i32) -> (i32, i32) {
    %c0_i32 = arith.constant 0 : i32
    %c0_i32_0 = arith.constant 0 : i32
    %c0_i32_1 = arith.constant 0 : i32
    return %c0_i32, %c0_i32_0 : i32, i32
  }
  func.func @transform_5(%arg0: i32) -> (i32, i32) {
    %c0_i32 = arith.constant 0 : i32
    %c0_i32_0 = arith.constant 0 : i32
    %c0_i32_1 = arith.constant 0 : i32
    return %c0_i32, %c0_i32_0 : i32, i32
  }
  func.func @transform_6(%arg0: i32) -> (i32, i32) {
    %c0_i32 = arith.constant 0 : i32
    %c0_i32_0 = arith.constant 0 : i32
    %c0_i32_1 = arith.constant 0 : i32
    return %c0_i32, %c0_i32_0 : i32, i32
  }
  func.func @transform_7(%arg0: i32) -> (i32, i32) {
    %c0_i32 = arith.constant 0 : i32
    %c0_i32_0 = arith.constant 0 : i32
    %c0_i32_1 = arith.constant 0 : i32
    return %c0_i32, %c0_i32_0 : i32, i32
  }
  func.func @transform_8(%arg0: i32) -> (i32, i32) {
    %c0_i32 = arith.constant 0 : i32
    %c0_i32_0 = arith.constant 0 : i32
    %c0_i32_1 = arith.constant 0 : i32
    return %c0_i32, %c0_i32_0 : i32, i32
  }
  func.func @transform_9(%arg0: i32) -> (i32, i32) {
    %c0_i32 = arith.constant 0 : i32
    %c0_i32_0 = arith.constant 0 : i32
    %c0_i32_1 = arith.constant 0 : i32
    return %c0_i32, %c0_i32_0 : i32, i32
  }
  func.func @transform_10(%arg0: i32) -> (i32, i32) {
    %c0_i32 = arith.constant 0 : i32
    %c0_i32_0 = arith.constant 0 : i32
    %c0_i32_1 = arith.constant 0 : i32
    return %c0_i32, %c0_i32_0 : i32, i32
  }
  func.func @transform_11(%arg0: i32) -> (i32, i32) {
    %c0_i32 = arith.constant 0 : i32
    %c0_i32_0 = arith.constant 0 : i32
    %c0_i32_1 = arith.constant 0 : i32
    return %c0_i32, %c0_i32_0 : i32, i32
  }
  func.func @transform_12(%arg0: i32) -> (i32, i32) {
    %c0_i32 = arith.constant 0 : i32
    %c0_i32_0 = arith.constant 0 : i32
    %c0_i32_1 = arith.constant 0 : i32
    return %c0_i32, %c0_i32_0 : i32, i32
  }
  func.func @transform_13(%arg0: i32) -> (i32, i32) {
    %c0_i32 = arith.constant 0 : i32
    %c0_i32_0 = arith.constant 0 : i32
    %c0_i32_1 = arith.constant 0 : i32
    return %c0_i32, %c0_i32_0 : i32, i32
  }
  func.func @transform_14(%arg0: i32) -> (i32, i32) {
    %c0_i32 = arith.constant 0 : i32
    %c0_i32_0 = arith.constant 0 : i32
    %c0_i32_1 = arith.constant 0 : i32
    return %c0_i32, %c0_i32_0 : i32, i32
  }
  func.func @transform_15(%arg0: i32) -> (i32, i32) {
    %c0_i32 = arith.constant 0 : i32
    %c0_i32_0 = arith.constant 0 : i32
    return %arg0, %c0_i32 : i32, i32
  }
}

</mosaic_0001>

<bundles_post_ra>
// kernel: gamma_linear_forward.1
= control target key start
LH: loop header
LB: loop body
LE: loop exit
PB: predicated region body
PF: predicated region fallthrough
CT: control target
= control target key end

     0   :  { %20 = vsyncpa [#allocation4], 0  ;;  %s1619_s0 = inlined_call_operand.vmem [shape: f32[8,32], index: 0, kind: input, shape index: {}]   ;;  %s1620_s1 = inlined_call_operand.vmem [shape: f32[8,32], index: 1, kind: input, shape index: {}]   ;;  %s1621_s2 = inlined_call_operand.vmem [shape: f32[8,16], index: 2, kind: input, shape index: {}]   ;;  %s1622_s3 = inlined_call_operand.vmem [shape: f32[128,128], index: 3, kind: input, shape index: {}]   ;;  %s1623_s4 = inlined_call_operand.vmem [shape: f32[1,128], index: 4, kind: input, shape index: {}]   ;;  %s1624_s5 = inlined_call_operand.vmem [shape: f32[128,128], index: 5, kind: input, shape index: {}]   ;;  %s1625_s6 = inlined_call_operand.vmem [shape: f32[1,128], index: 6, kind: input, shape index: {}]   ;;  %s1626_s7 = inlined_call_operand.hbm [shape: f32[128,128], index: 7, kind: input, shape index: {}]   ;;  %s1627_s8 = inlined_call_operand.vmem [shape: f32[1,128], index: 8, kind: input, shape index: {}]   ;;  %s1628_s9 = inlined_call_operand.hbm [shape: f32[128,128], index: 9, kind: input, shape index: {}]   ;;  %s1629_s10 = inlined_call_operand.vmem [shape: f32[1,128], index: 10, kind: input, shape index: {}]   ;;  %s1630_s11 = inlined_call_operand.hbm [shape: f32[128,128], index: 11, kind: input, shape index: {}]   ;;  %s1631_s12 = inlined_call_operand.vmem [shape: f32[1,128], index: 12, kind: input, shape index: {}]   ;;  %s1632_s13 = inlined_call_operand.hbm [shape: f32[128,128], index: 13, kind: input, shape index: {}]   ;;  %s1633_s14 = inlined_call_operand.vmem [shape: f32[1,128], index: 14, kind: input, shape index: {}]   ;;  %s1634_s15 = inlined_call_operand.vmem [shape: f32[8,2], index: 15, kind: output, shape index: {}]  }
   0x1   :  { %21 = vsyncpa [#allocation6], 0 }
   0x2   :  { %22 = vsyncpa [#allocation9], 0  ;;  %s1267_s18 = smov [#allocation5]   ;;  %s1268_s20 = smov [#allocation3]  }
   0x3   :  { %s56_s19 = sshll.u32 %s1267_s18, 4  ;;  %s42_s21 = sshll.u32 %s1268_s20, 4  ;;  %s57_s19 = int_to_ptr.vmem [resolvable:$true] %s56_s19  ;;  %s1358_s21 = int_to_ptr.vmem [resolvable:$true] %s42_s21 }
   0x4   :  { %s1173_s24 = scalar_lea.hbm %s1628_s9, 2048 }
   0x5   :  { %p1174_p0 = scmp.ne.s32.totalorder %s1628_s9, %s1173_s24  ;;  %p1177_p1 = scmp.lt.u32.totalorder %s1173_s24, %s1628_s9 }
   0x7   :  { %p1179_p2 = pnand %p1177_p1, %p1174_p0 }
   0x9   :  { %1182 = shalt.err (!%p1179_p2)
}
   0xa   :  { %s1183_s29 = scalar_lea.vmem %s57_s19, 2048  ;;  %p1188_p4 = scmp.lt.s32.totalorder %s57_s19, %s57_s19 }
   0xb   :  { %p1184_p3 = scmp.ne.s32.totalorder %s57_s19, %s1183_s29  ;;  %p1189_p5 = scmp.lt.s32.totalorder %s1183_s29, %s1183_s29 }
   0xd   :  { %p1190_p6 = por %p1189_p5, %p1188_p4 }
   0xf   :  { %p1191_p7 = pnand %p1190_p6, %p1184_p3 }
  0x11   :  { %1194 = shalt.err (!%p1191_p7)
}
  0x12   :  { %s1269_s30 = smov 128   ;;  %s1270_s16 = smov 8  }
  0x13   :  { %62 = dma.hbm_to_vmem [thread:$0]  %s1628_s9, 2048, %s57_s19, [#allocation6], %s1269_s30, %s1269_s30, %s1270_s16  }
  0x14   :  { %s1195_s23 = scalar_lea.hbm %s1626_s7, 2048 }
  0x15   :  { %p1196_p8 = scmp.ne.s32.totalorder %s1626_s7, %s1195_s23  ;;  %p1199_p9 = scmp.lt.u32.totalorder %s1195_s23, %s1626_s7 }
  0x17   :  { %p1201_p10 = pnand %p1199_p9, %p1196_p8 }
  0x19   :  { %1204 = shalt.err (!%p1201_p10)
}
  0x1a   :  { %s1205_s28 = scalar_lea.vmem %s1358_s21, 2048  ;;  %p1210_p12 = scmp.lt.s32.totalorder %s1358_s21, %s1358_s21 }
  0x1b   :  { %p1206_p11 = scmp.ne.s32.totalorder %s1358_s21, %s1205_s28  ;;  %p1211_p13 = scmp.lt.s32.totalorder %s1205_s28, %s1205_s28 }
  0x1d   :  { %p1212_p0 = por %p1211_p13, %p1210_p12 }
  0x1f   :  { %p1213_p1 = pnand %p1212_p0, %p1206_p11 }
  0x21   :  { %1216 = shalt.err (!%p1213_p1)
}
  0x22   :  { %48 = dma.hbm_to_vmem [thread:$0]  %s1626_s7, 2048, %s1358_s21, [#allocation4], %s1269_s30, %s1269_s30, %s1270_s16  }
  0x23   :  { %s1271_s29 = smov [#allocation7]   ;;  %s1272_s18 = smov [#allocation8]  }
  0x24   :  { %s70_s17 = sshll.u32 %s1271_s29, 4  ;;  %s84_s20 = sshll.u32 %s1272_s18, 4  ;;  %s71_s17 = int_to_ptr.vmem [resolvable:$true] %s70_s17  ;;  %s1395_s20 = int_to_ptr.vmem [resolvable:$true] %s84_s20 }
  0x25   :  { %s1217_s24 = scalar_lea.hbm %s1630_s11, 2048 }
  0x26   :  { %p1218_p2 = scmp.ne.s32.totalorder %s1630_s11, %s1217_s24  ;;  %p1221_p3 = scmp.lt.u32.totalorder %s1217_s24, %s1630_s11 }
  0x28   :  { %p1223_p4 = pnand %p1221_p3, %p1218_p2 }
  0x2a   :  { %1226 = shalt.err (!%p1223_p4)
}
  0x2b   :  { %s1227_s7 = scalar_lea.vmem %s71_s17, 2048  ;;  %p1232_p6 = scmp.lt.s32.totalorder %s71_s17, %s71_s17 }
  0x2c   :  { %p1228_p5 = scmp.ne.s32.totalorder %s71_s17, %s1227_s7  ;;  %p1233_p7 = scmp.lt.s32.totalorder %s1227_s7, %s1227_s7 }
  0x2e   :  { %p1234_p8 = por %p1233_p7, %p1232_p6 }
  0x30   :  { %p1235_p9 = pnand %p1234_p8, %p1228_p5 }
  0x32   :  { %1238 = shalt.err (!%p1235_p9)
}
  0x33   :  { %76 = dma.hbm_to_vmem [thread:$0]  %s1630_s11, 2048, %s71_s17, [#allocation6], %s1269_s30, %s1269_s30, %s1270_s16  }
  0x34   :  { %s1239_s18 = scalar_lea.hbm %s1632_s13, 2048 }
  0x35   :  { %p1240_p10 = scmp.ne.s32.totalorder %s1632_s13, %s1239_s18  ;;  %p1243_p11 = scmp.lt.u32.totalorder %s1239_s18, %s1632_s13 }
  0x37   :  { %p1245_p12 = pnand %p1243_p11, %p1240_p10 }
  0x39   :  { %1248 = shalt.err (!%p1245_p12)
}
  0x3a   :  { %s1249_s26 = scalar_lea.vmem %s1395_s20, 2048  ;;  %p1254_p0 = scmp.lt.s32.totalorder %s1395_s20, %s1395_s20 }
  0x3b   :  { %p1250_p13 = scmp.ne.s32.totalorder %s1395_s20, %s1249_s26  ;;  %p1255_p1 = scmp.lt.s32.totalorder %s1249_s26, %s1249_s26 }
  0x3d   :  { %p1256_p2 = por %p1255_p1, %p1254_p0 }
  0x3f   :  { %p1257_p3 = pnand %p1256_p2, %p1250_p13 }
  0x41   :  { %1260 = shalt.err (!%p1257_p3)
}
  0x42   :  { %90 = dma.hbm_to_vmem [thread:$0]  %s1632_s13, 2048, %s1395_s20, [#allocation9], %s1269_s30, %s1269_s30, %s1270_s16  }
  0x43   :  { %1261 = dma.done.wait [#allocation4], 2048  }
  0x44   :  { %1262 = vsyncadd [#allocation4], 4294965248 }
  0x45   :  { %1263 = dma.done.wait [#allocation6], 4096  }
  0x46   :  { %1264 = vsyncadd [#allocation6], 4294963200 }
  0x47   :  { %1265 = dma.done.wait [#allocation9], 2048  }
  0x48   :  { %1266 = vsyncadd [#allocation9], 4294965248  ;;  %v1273_v0 = vmov 0.0|0.0   ;;  %vm1274_vm0 = vmmov 0   ;;  %v1275_v1 = vmov 0.0   ;;  %v108_v2 = vld [vmem:[%s1620_s1] sm:$0xff] }
  0x49   :  { %1016 = vmatprep.subr.bf16.mxu0 %v1273_v0  ;;  %1040 = vmatprep.subr.bf16.mxu1 %v1273_v0  ;;  %v125_v3 = vld [vmem:[%s1622_s3] sm:$0xff]  ;;  %s1276_s27 = smov 32   ;;  %v126_v4 = vld [vmem:[%s1622_s3 + $0x8] sm:$0xff]  ;;  %v127_v5 = vld [vmem:[%s1622_s3 + $0x10] sm:$0xff]  ;;  %vm106_vm1 = vcmask 261120   ;;  %s1277_s24 = smov 64  }
  0x4a   :  { %838 = vmatprep.mubr.msk.f32.mxu0 %vm1274_vm0, %v1275_v1  ;;  %873 = vmatprep.mubr.msk.f32.mxu1 %vm1274_vm0, %v1275_v1  ;;  %v128_v6 = vld [vmem:[%s1622_s3 + $0x18] sm:$0xff]  ;;  %v115_v7 = vld [vmem:[%s1621_s2] sm:$0xff]  ;;  %v1017_v8 = vpack.c.bf16 %v126_v4, %v125_v3  ;;  %v130_v12 = vld [vmem:[%s1622_s3 + $0x28] sm:$0xff]  ;;  %vm113_vm2 = vcmask 523520   ;;  %vm120_vm3 = vcmask 654848   ;;  %vm122_vm4 = vcmask 1048192  }
  0x4b   :  { %110 = vrot.lane.b32.xlu0 %v108_v2, %s1276_s27  ;;  %v1020_v9 = vpack.c.bf16 %v128_v6, %v127_v5  ;;  %v105_v10 = vld [vmem:[%s1619_s0] sm:$0xff]  ;;  %v220_v14 = vld [vmem:[%s1624_s5 + $0x8] sm:$0xff]  ;;  %v221_v16 = vld [vmem:[%s1624_s5 + $0x10] sm:$0xff]  ;;  %vm689_vm5 = vcmask 15360  }
  0x4c   :  { %1018 = vmatpush3.bf16.msra.mxu0 %v1017_v8  ;;  %v129_v11 = vld [vmem:[%s1622_s3 + $0x20] sm:$0xff]  ;;  %107 = vst.msk [vmem:[#allocation2] sm:$0xff] %vm106_vm1, %v105_v10  ;;  %v222_v17 = vld [vmem:[%s1624_s5 + $0x18] sm:$0xff]  ;;  %v131_v19 = vld [vmem:[%s1622_s3 + $0x30] sm:$0xff] }
  0x4d   :  { %1019 = vmatprep.subr.bf16.mxu0 %v1273_v0  ;;  %v219_v13 = vld [vmem:[%s1624_s5] sm:$0xff]  ;;  %v1023_v18 = vpack.c.bf16 %v130_v12, %v129_v11  ;;  %v132_v20 = vld [vmem:[%s1622_s3 + $0x38] sm:$0xff]  ;;  %v1044_v21 = vpack.c.bf16 %v222_v17, %v221_v16  ;;  %v224_v23 = vld [vmem:[%s1624_s5 + $0x28] sm:$0xff] }
  0x4e   :  { %v1041_v15 = vpack.c.bf16 %v220_v14, %v219_v13  ;;  %v223_v22 = vld [vmem:[%s1624_s5 + $0x20] sm:$0xff]  ;;  %v1026_v24 = vpack.c.bf16 %v132_v20, %v131_v19  ;;  %v134_v26 = vld [vmem:[%s1622_s3 + $0x48] sm:$0xff]  ;;  %v225_v28 = vld [vmem:[%s1624_s5 + $0x30] sm:$0xff] }
  0x4f   :  { %117 = vrot.lane.b32.xlu0 %v115_v7, %s1277_s24  ;;  %v133_v25 = vld [vmem:[%s1622_s3 + $0x40] sm:$0xff]  ;;  %v1047_v27 = vpack.c.bf16 %v224_v23, %v223_v22  ;;  %v226_v29 = vld [vmem:[%s1624_s5 + $0x38] sm:$0xff]  ;;  %v135_v31 = vld [vmem:[%s1622_s3 + $0x50] sm:$0xff] }
  0x50   :  { %1021 = vmatpush3.bf16.msra.mxu0 %v1020_v9  ;;  %1042 = vmatpush3.bf16.msra.mxu1 %v1041_v15  ;;  %v1029_v30 = vpack.c.bf16 %v134_v26, %v133_v25  ;;  %v136_v32 = vld [vmem:[%s1622_s3 + $0x58] sm:$0xff]  ;;  %v1050_v33 = vpack.c.bf16 %v226_v29, %v225_v28  ;;  %v227_v34 = vld [vmem:[%s1624_s5 + $0x40] sm:$0xff]  ;;  %v228_v35 = vld [vmem:[%s1624_s5 + $0x48] sm:$0xff] }
  0x51   :  { %1022 = vmatprep.subr.bf16.mxu0 %v1273_v0  ;;  %1043 = vmatprep.subr.bf16.mxu1 %v1273_v0  ;;  %v1032_v36 = vpack.c.bf16 %v136_v32, %v135_v31  ;;  %v137_v37 = vld [vmem:[%s1622_s3 + $0x60] sm:$0xff]  ;;  %v138_v38 = vld [vmem:[%s1622_s3 + $0x68] sm:$0xff]  ;;  %v1053_v39 = vpack.c.bf16 %v228_v35, %v227_v34  ;;  %v229_v40 = vld [vmem:[%s1624_s5 + $0x50] sm:$0xff] }
  0x52   :  { %v230_v41 = vld [vmem:[%s1624_s5 + $0x58] sm:$0xff]  ;;  %v1035_v42 = vpack.c.bf16 %v138_v38, %v137_v37  ;;  %v139_v43 = vld [vmem:[%s1622_s3 + $0x70] sm:$0xff]  ;;  %v231_v46 = vld [vmem:[%s1624_s5 + $0x60] sm:$0xff] }
  0x53   :  { %v140_v44 = vld [vmem:[%s1622_s3 + $0x78] sm:$0xff]  ;;  %v1056_v45 = vpack.c.bf16 %v230_v41, %v229_v40  ;;  %v232_v47 = vld [vmem:[%s1624_s5 + $0x68] sm:$0xff]  ;;  %v233_v53 = vld [vmem:[%s1624_s5 + $0x70] sm:$0xff] }
  0x54   :  { %1024 = vmatpush3.bf16.msra.mxu0 %v1023_v18  ;;  %1045 = vmatpush3.bf16.msra.mxu1 %v1044_v21  ;;  %v1038_v48 = vpack.c.bf16 %v140_v44, %v139_v43  ;;  %v1059_v49 = vpack.c.bf16 %v232_v47, %v231_v46  ;;  %v234_v54 = vld [vmem:[%s1624_s5 + $0x78] sm:$0xff]  ;;  %v313_v56 = vld [vmem:[#allocation3] sm:$0xff]  ;;  %v314_v57 = vld [vmem:[#allocation3 + $0x8] sm:$0xff] }
  0x55   :  { %1025 = vmatprep.subr.bf16.mxu0 %v1273_v0  ;;  %1046 = vmatprep.subr.bf16.mxu1 %v1273_v0  ;;  %v1062_v55 = vpack.c.bf16 %v234_v54, %v233_v53  ;;  %v315_v58 = vld [vmem:[#allocation3 + $0x10] sm:$0xff]  ;;  %v1065_v59 = vpack.c.bf16 %v314_v57, %v313_v56  ;;  %v316_v60 = vld [vmem:[#allocation3 + $0x18] sm:$0xff]  ;;  %v317_v62 = vld [vmem:[#allocation3 + $0x20] sm:$0xff] }
  0x56   :  { %v1068_v61 = vpack.c.bf16 %v316_v60, %v315_v58  ;;  %v318_v63 = vld [vmem:[#allocation3 + $0x28] sm:$0xff]  ;;  %v319_v3 = vld [vmem:[#allocation3 + $0x30] sm:$0xff]  ;;  %v320_v4 = vld [vmem:[#allocation3 + $0x38] sm:$0xff] }
  0x57   :  { %v1071_v2 = vpack.c.bf16 %v318_v63, %v317_v62  ;;  %v1074_v5 = vpack.c.bf16 %v320_v4, %v319_v3  ;;  %v321_v6 = vld [vmem:[#allocation3 + $0x40] sm:$0xff]  ;;  %v322_v7 = vld [vmem:[#allocation3 + $0x48] sm:$0xff]  ;;  %v323_v9 = vld [vmem:[#allocation3 + $0x50] sm:$0xff] }
  0x58   :  { %1027 = vmatpush3.bf16.msra.mxu0 %v1026_v24  ;;  %1048 = vmatpush3.bf16.msra.mxu1 %v1047_v27  ;;  %v1077_v8 = vpack.c.bf16 %v322_v7, %v321_v6  ;;  %v324_v10 = vld [vmem:[#allocation3 + $0x58] sm:$0xff]  ;;  %v325_v12 = vld [vmem:[#allocation3 + $0x60] sm:$0xff]  ;;  %v326_v13 = vld [vmem:[#allocation3 + $0x68] sm:$0xff] }
  0x59   :  { %1028 = vmatprep.subr.bf16.mxu0 %v1273_v0  ;;  %1049 = vmatprep.subr.bf16.mxu1 %v1273_v0  ;;  %v1080_v11 = vpack.c.bf16 %v324_v10, %v323_v9  ;;  %v1083_v14 = vpack.c.bf16 %v326_v13, %v325_v12  ;;  %v698_v15 = vld [vmem:[%s1623_s4] ss:$0 sm:$0xff]  ;;  %v327_v20 = vld [vmem:[#allocation3 + $0x70] sm:$0xff]  ;;  %v407_v23 = vld [vmem:[#allocation5] sm:$0xff] }
  0x5a   :  { %v328_v21 = vld [vmem:[#allocation3 + $0x78] sm:$0xff]  ;;  %v408_v24 = vld [vmem:[#allocation5 + $0x8] sm:$0xff]  ;;  %v409_v25 = vld [vmem:[#allocation5 + $0x10] sm:$0xff] }
  0x5b   :  { %v1086_v22 = vpack.c.bf16 %v328_v21, %v327_v20  ;;  %v1089_v26 = vpack.c.bf16 %v408_v24, %v407_v23  ;;  %v410_v27 = vld [vmem:[#allocation5 + $0x18] sm:$0xff]  ;;  %v411_v29 = vld [vmem:[#allocation5 + $0x20] sm:$0xff]  ;;  %v413_v32 = vld [vmem:[#allocation5 + $0x30] sm:$0xff] }
  0x5c   :  { %1030 = vmatpush3.bf16.msra.mxu0 %v1029_v30  ;;  %1051 = vmatpush3.bf16.msra.mxu1 %v1050_v33  ;;  %v1092_v28 = vpack.c.bf16 %v410_v27, %v409_v25  ;;  %v412_v30 = vld [vmem:[#allocation5 + $0x28] sm:$0xff]  ;;  %v414_v33 = vld [vmem:[#allocation5 + $0x38] sm:$0xff]  ;;  %v415_v35 = vld [vmem:[#allocation5 + $0x40] sm:$0xff] }
  0x5d   :  { %1031 = vmatprep.subr.bf16.mxu0 %v1273_v0  ;;  %1052 = vmatprep.subr.bf16.mxu1 %v1273_v0  ;;  %v1095_v31 = vpack.c.bf16 %v412_v30, %v411_v29  ;;  %v1098_v34 = vpack.c.bf16 %v414_v33, %v413_v32  ;;  %v417_v38 = vld [vmem:[#allocation5 + $0x50] sm:$0xff]  ;;  %v419_v41 = vld [vmem:[#allocation5 + $0x60] sm:$0xff]  ;;  %v699_v44 = vld [vmem:[%s1625_s6] ss:$0 sm:$0xff] }
  0x5e   :  { %v502_v53 = vld [vmem:[#allocation7 + $0x8] sm:$0xff]  ;;  %v503_v54 = vld [vmem:[#allocation7 + $0x10] sm:$0xff]  ;;  %v504_v56 = vld [vmem:[#allocation7 + $0x18] sm:$0xff] }
  0x5f   :  { %v1116_v57 = vpack.c.bf16 %v504_v56, %v503_v54  ;;  %v505_v58 = vld [vmem:[#allocation7 + $0x20] sm:$0xff]  ;;  %v508_v62 = vld [vmem:[#allocation7 + $0x38] sm:$0xff]  ;;  %v510_v3 = vld [vmem:[#allocation7 + $0x48] sm:$0xff] }
  0x60   :  { %1033 = vmatpush3.bf16.msra.mxu0 %v1032_v36  ;;  %1054 = vmatpush3.bf16.msra.mxu1 %v1053_v39  ;;  %v416_v36 = vld [vmem:[#allocation5 + $0x48] sm:$0xff]  ;;  %v418_v39 = vld [vmem:[#allocation5 + $0x58] sm:$0xff]  ;;  %v597_v21 = vld [vmem:[#allocation8 + $0x10] sm:$0xff] }
  0x61   :  { %1034 = vmatprep.subr.bf16.mxu0 %v1273_v0  ;;  %1055 = vmatprep.subr.bf16.mxu1 %v1273_v0  ;;  %v1101_v37 = vpack.c.bf16 %v416_v36, %v415_v35  ;;  %v1104_v40 = vpack.c.bf16 %v418_v39, %v417_v38  ;;  %v512_v6 = vld [vmem:[#allocation7 + $0x58] sm:$0xff]  ;;  %v514_v9 = vld [vmem:[#allocation7 + $0x68] sm:$0xff]  ;;  %v599_v25 = vld [vmem:[#allocation8 + $0x20] sm:$0xff] }
  0x62   :  { %v596_v20 = vld [vmem:[#allocation8 + $0x8] sm:$0xff]  ;;  %v598_v23 = vld [vmem:[#allocation8 + $0x18] sm:$0xff]  ;;  %v603_v30 = vld [vmem:[#allocation8 + $0x40] sm:$0xff] }
  0x63   :  { %v1140_v24 = vpack.c.bf16 %v598_v23, %v597_v21  ;;  %v605_v33 = vld [vmem:[#allocation8 + $0x50] sm:$0xff]  ;;  %v607_v36 = vld [vmem:[#allocation8 + $0x60] sm:$0xff]  ;;  %v701_v39 = vld [vmem:[%s1629_s10] ss:$0 sm:$0xff] }
  0x64   :  { %1036 = vmatpush3.bf16.msra.mxu0 %v1035_v42  ;;  %1057 = vmatpush3.bf16.msra.mxu1 %v1056_v45  ;;  %v420_v42 = vld [vmem:[#allocation5 + $0x68] sm:$0xff] }
  0x65   :  { %1037 = vmatprep.subr.bf16.mxu0 %v1273_v0  ;;  %1058 = vmatprep.subr.bf16.mxu1 %v1273_v0  ;;  %v1107_v43 = vpack.c.bf16 %v420_v42, %v419_v41 }
  0x68   :  { %1039 = vmatpush3.bf16.msra.mxu0 %v1038_v48  ;;  %1060 = vmatpush3.bf16.msra.mxu1 %v1059_v49  ;;  %v421_v49 = vld [vmem:[#allocation5 + $0x70] sm:$0xff] }
  0x69   :  { %1064 = vmatprep.subr.bf16.mxu0 %v1273_v0  ;;  %1061 = vmatprep.subr.bf16.mxu1 %v1273_v0 }
  0x6c   :  { %1063 = vmatpush3.bf16.msra.mxu1 %v1062_v55 }
  0x6d   :  { %1088 = vmatprep.subr.bf16.mxu1 %v1273_v0 }
  0xbd   :  { %v111_v50 = vpop.permute.xlu0 %110 }
  0xbe   :  { %114 = vst.msk [vmem:[#allocation2] sm:$0xff] %vm113_vm2, %v111_v50  ;;  %v422_v50 = vld [vmem:[#allocation5 + $0x78] sm:$0xff] }
  0xc1   :  { %v118_v51 = vpop.permute.xlu0 %117 }
  0xc2   :  { %121 = vst.msk [vmem:[#allocation2] sm:$0xff] %vm120_vm3, %v118_v51  ;;  %v1110_v51 = vpack.c.bf16 %v422_v50, %v421_v49 }
  0xc3   :  { %123 = vst.msk [vmem:[#allocation2] sm:$0xff] %vm122_vm4, %v1275_v1 }
  0xca   :  { %v124_v52 = vld [vmem:[#allocation2] sm:$0xff] }
  0xcb   :  { %839 = vmatmul.mubr.f32.vlgmr.msra.gmra.mrb[0].mxu0 %v124_v52  ;;  %v501_v52 = vld [vmem:[#allocation7] sm:$0xff] }
  0xcc   :  { %908 = vmatprep.mubr.msk.f32.mxu0 %vm1274_vm0, %v1275_v1  ;;  %1066 = vmatpush3.bf16.msra.mxu0 %v1065_v59  ;;  %v1113_v55 = vpack.c.bf16 %v502_v53, %v501_v52  ;;  %v506_v59 = vld [vmem:[#allocation7 + $0x28] sm:$0xff] }
  0xcd   :  { %1067 = vmatprep.subr.bf16.mxu0 %v1273_v0  ;;  %v1119_v60 = vpack.c.bf16 %v506_v59, %v505_v58 }
  0xd0   :  { %1069 = vmatpush3.bf16.msra.mxu0 %v1068_v61  ;;  %v507_v61 = vld [vmem:[#allocation7 + $0x30] sm:$0xff] }
  0xd1   :  { %1070 = vmatprep.subr.bf16.mxu0 %v1273_v0  ;;  %v1122_v63 = vpack.c.bf16 %v508_v62, %v507_v61 }
  0xd4   :  { %1072 = vmatpush3.bf16.msra.mxu0 %v1071_v2  ;;  %v509_v2 = vld [vmem:[#allocation7 + $0x40] sm:$0xff] }
  0xd5   :  { %1073 = vmatprep.subr.bf16.mxu0 %v1273_v0  ;;  %v1125_v4 = vpack.c.bf16 %v510_v3, %v509_v2 }
  0xd8   :  { %1075 = vmatpush3.bf16.msra.mxu0 %v1074_v5  ;;  %v511_v5 = vld [vmem:[#allocation7 + $0x50] sm:$0xff] }
  0xd9   :  { %1076 = vmatprep.subr.bf16.mxu0 %v1273_v0  ;;  %v1128_v7 = vpack.c.bf16 %v512_v6, %v511_v5 }
  0xdc   :  { %1078 = vmatpush3.bf16.msra.mxu0 %v1077_v8  ;;  %v513_v8 = vld [vmem:[#allocation7 + $0x60] sm:$0xff] }
  0xdd   :  { %1079 = vmatprep.subr.bf16.mxu0 %v1273_v0  ;;  %v1131_v10 = vpack.c.bf16 %v514_v9, %v513_v8 }
  0xe0   :  { %1081 = vmatpush3.bf16.msra.mxu0 %v1080_v11  ;;  %v700_v11 = vld [vmem:[%s1627_s8] ss:$0 sm:$0xff] }
  0xe1   :  { %1082 = vmatprep.subr.bf16.mxu0 %v1273_v0 }
  0xe4   :  { %1084 = vmatpush3.bf16.msra.mxu0 %v1083_v14 }
  0xe5   :  { %1085 = vmatprep.subr.bf16.mxu0 %v1273_v0 }
  0xe8   :  { %1087 = vmatpush3.bf16.msra.mxu0 %v1086_v22 }
  0xe9   :  { %1112 = vmatprep.subr.bf16.mxu0 %v1273_v0 }
 0x19e   :  { %v214_v16 = vpop.f32.mrb[0].mxu0 }
 0x19f   :  { %v215_v17 = vadd.f32 %v698_v15, %v214_v16  ;;  %v840_v18 = vpop.f32.mrb[1].mxu0  ;;  %v515_v16 = vld [vmem:[#allocation7 + $0x70] sm:$0xff] }
 0x1a1   :  { %v218_v19 = vmax.f32 %v215_v17, 0.0  ;;  %v516_v17 = vld [vmem:[#allocation7 + $0x78] sm:$0xff] }
 0x1a2   :  { %v1134_v18 = vpack.c.bf16 %v516_v17, %v515_v16 }
 0x1a3   :  { %874 = vmatmul.mubr.f32.vlgmr.msra.gmra.mrb[0].mxu1 %v218_v19  ;;  %v595_v19 = vld [vmem:[#allocation8] sm:$0xff] }
 0x1a4   :  { %943 = vmatprep.mubr.msk.f32.mxu1 %vm1274_vm0, %v1275_v1  ;;  %1090 = vmatpush3.bf16.msra.mxu1 %v1089_v26  ;;  %v1137_v22 = vpack.c.bf16 %v596_v20, %v595_v19  ;;  %v600_v26 = vld [vmem:[#allocation8 + $0x28] sm:$0xff] }
 0x1a5   :  { %1091 = vmatprep.subr.bf16.mxu1 %v1273_v0  ;;  %v1143_v27 = vpack.c.bf16 %v600_v26, %v599_v25 }
 0x1a8   :  { %1093 = vmatpush3.bf16.msra.mxu1 %v1092_v28  ;;  %v602_v28 = vld [vmem:[#allocation8 + $0x38] sm:$0xff] }
 0x1a9   :  { %1094 = vmatprep.subr.bf16.mxu1 %v1273_v0 }
 0x1ac   :  { %1096 = vmatpush3.bf16.msra.mxu1 %v1095_v31  ;;  %v604_v31 = vld [vmem:[#allocation8 + $0x48] sm:$0xff] }
 0x1ad   :  { %1097 = vmatprep.subr.bf16.mxu1 %v1273_v0  ;;  %v1149_v32 = vpack.c.bf16 %v604_v31, %v603_v30 }
 0x1b0   :  { %1099 = vmatpush3.bf16.msra.mxu1 %v1098_v34  ;;  %v606_v34 = vld [vmem:[#allocation8 + $0x58] sm:$0xff] }
 0x1b1   :  { %1100 = vmatprep.subr.bf16.mxu1 %v1273_v0  ;;  %v1152_v35 = vpack.c.bf16 %v606_v34, %v605_v33 }
 0x1b4   :  { %1102 = vmatpush3.bf16.msra.mxu1 %v1101_v37  ;;  %v608_v37 = vld [vmem:[#allocation8 + $0x68] sm:$0xff] }
 0x1b5   :  { %1103 = vmatprep.subr.bf16.mxu1 %v1273_v0  ;;  %v1155_v38 = vpack.c.bf16 %v608_v37, %v607_v36 }
 0x1b8   :  { %1105 = vmatpush3.bf16.msra.mxu1 %v1104_v40 }
 0x1b9   :  { %1106 = vmatprep.subr.bf16.mxu1 %v1273_v0 }
 0x1bc   :  { %1108 = vmatpush3.bf16.msra.mxu1 %v1107_v43 }
 0x1bd   :  { %1109 = vmatprep.subr.bf16.mxu1 %v1273_v0 }
 0x1c0   :  { %1111 = vmatpush3.bf16.msra.mxu1 %v1110_v51  ;;  %v703_v51 = vld [vmem:[%s1633_s14] ss:$0 sm:$0xff] }
 0x1c1   :  { %1136 = vmatprep.subr.bf16.mxu1 %v1273_v0 }
 0x276   :  { %v308_v45 = vpop.f32.mrb[0].mxu1 }
 0x277   :  { %v309_v46 = vadd.f32 %v699_v44, %v308_v45  ;;  %v875_v47 = vpop.f32.mrb[1].mxu1  ;;  %v609_v44 = vld [vmem:[#allocation8 + $0x70] sm:$0xff]  ;;  %v610_v45 = vld [vmem:[#allocation8 + $0x78] sm:$0xff] }
 0x278   :  { %v702_v47 = vld [vmem:[%s1631_s12] ss:$0 sm:$0xff] }
 0x279   :  { %v312_v48 = vmax.f32 %v309_v46, 0.0  ;;  %v1158_v46 = vpack.c.bf16 %v610_v45, %v609_v44 }
 0x27b   :  { %909 = vmatmul.mubr.f32.vlgmr.msra.gmra.mrb[2].mxu0 %v312_v48 }
 0x27c   :  { %978 = vmatprep.mubr.msk.f32.mxu0 %vm1274_vm0, %v1275_v1  ;;  %1114 = vmatpush3.bf16.msra.mxu0 %v1113_v55 }
 0x27d   :  { %1115 = vmatprep.subr.bf16.mxu0 %v1273_v0 }
 0x280   :  { %1117 = vmatpush3.bf16.msra.mxu0 %v1116_v57 }
 0x281   :  { %1118 = vmatprep.subr.bf16.mxu0 %v1273_v0 }
 0x284   :  { %1120 = vmatpush3.bf16.msra.mxu0 %v1119_v60 }
 0x285   :  { %1121 = vmatprep.subr.bf16.mxu0 %v1273_v0 }
 0x288   :  { %1123 = vmatpush3.bf16.msra.mxu0 %v1122_v63 }
 0x289   :  { %1124 = vmatprep.subr.bf16.mxu0 %v1273_v0 }
 0x28c   :  { %1126 = vmatpush3.bf16.msra.mxu0 %v1125_v4 }
 0x28d   :  { %1127 = vmatprep.subr.bf16.mxu0 %v1273_v0 }
 0x290   :  { %1129 = vmatpush3.bf16.msra.mxu0 %v1128_v7 }
 0x291   :  { %1130 = vmatprep.subr.bf16.mxu0 %v1273_v0 }
 0x294   :  { %1132 = vmatpush3.bf16.msra.mxu0 %v1131_v10 }
 0x295   :  { %1133 = vmatprep.subr.bf16.mxu0 %v1273_v0 }
 0x298   :  { %1135 = vmatpush3.bf16.msra.mxu0 %v1134_v18 }
 0x34e   :  { %v402_v12 = vpop.f32.mrb[2].mxu0 }
 0x34f   :  { %v403_v13 = vadd.f32 %v700_v11, %v402_v12  ;;  %v910_v14 = vpop.f32.mrb[3].mxu0 }
 0x351   :  { %v406_v15 = vmax.f32 %v403_v13, 0.0 }
 0x353   :  { %944 = vmatmul.mubr.f32.vlgmr.msra.gmra.mrb[2].mxu1 %v406_v15 }
 0x354   :  { %1013 = vmatprep.mubr.msk.f32.mxu1 %vm1274_vm0, %v1275_v1  ;;  %1138 = vmatpush3.bf16.msra.mxu1 %v1137_v22  ;;  %v601_v1 = vld [vmem:[#allocation8 + $0x30] sm:$0xff] }
 0x355   :  { %1139 = vmatprep.subr.bf16.mxu1 %v1273_v0  ;;  %v1146_v29 = vpack.c.bf16 %v602_v28, %v601_v1 }
 0x358   :  { %1141 = vmatpush3.bf16.msra.mxu1 %v1140_v24 }
 0x359   :  { %1142 = vmatprep.subr.bf16.mxu1 %v1273_v0 }
 0x35c   :  { %1144 = vmatpush3.bf16.msra.mxu1 %v1143_v27 }
 0x35d   :  { %1145 = vmatprep.subr.bf16.mxu1 %v1273_v0 }
 0x360   :  { %1147 = vmatpush3.bf16.msra.mxu1 %v1146_v29 }
 0x361   :  { %1148 = vmatprep.subr.bf16.mxu1 %v1273_v0 }
 0x364   :  { %1150 = vmatpush3.bf16.msra.mxu1 %v1149_v32 }
 0x365   :  { %1151 = vmatprep.subr.bf16.mxu1 %v1273_v0 }
 0x368   :  { %1153 = vmatpush3.bf16.msra.mxu1 %v1152_v35 }
 0x369   :  { %1154 = vmatprep.subr.bf16.mxu1 %v1273_v0 }
 0x36c   :  { %1156 = vmatpush3.bf16.msra.mxu1 %v1155_v38 }
 0x36d   :  { %1157 = vmatprep.subr.bf16.mxu1 %v1273_v0 }
 0x370   :  { %1159 = vmatpush3.bf16.msra.mxu1 %v1158_v46 }
 0x426   :  { %v496_v40 = vpop.f32.mrb[2].mxu1 }
 0x427   :  { %v497_v41 = vadd.f32 %v701_v39, %v496_v40  ;;  %v945_v42 = vpop.f32.mrb[3].mxu1 }
 0x429   :  { %v500_v43 = vmax.f32 %v497_v41, 0.0 }
 0x42b   :  { %979 = vmatmul.mubr.f32.vlgmr.msra.gmra.mrb[4].mxu0 %v500_v43 }
 0x4fe   :  { %v590_v48 = vpop.f32.mrb[4].mxu0 }
 0x4ff   :  { %v591_v49 = vadd.f32 %v702_v47, %v590_v48  ;;  %v980_v0 = vpop.f32.mrb[5].mxu0 }
 0x501   :  { %v594_v50 = vmax.f32 %v591_v49, 0.0 }
 0x503   :  { %1014 = vmatmul.mubr.f32.vlgmr.msra.gmra.mrb[4].mxu1 %v594_v50 }
 0x5d6   :  { %v684_v52 = vpop.f32.mrb[4].mxu1 }
 0x5d7   :  { %v685_v53 = vadd.f32 %v703_v51, %v684_v52  ;;  %v1015_v54 = vpop.f32.mrb[5].mxu1 }
 0x5d9   :  { %1171 = vtanh.f32 %v685_v53 }
 0x5e3   :  { %v1172_v55 = vpop.eup %1171 }
 0x5e4   :  { %690 = vst.msk [vmem:[%s1634_s15] sm:$0xff] %vm689_vm5, %v1172_v55 }
 0x5e5   :  { %695 = vsyncpa [#allocation4], 1 }
 0x5e6   :  { %696 = vsyncpa [#allocation6], 1 }
 0x5e7   :  { %697 = vsyncpa [#allocation9], 1 }

</bundles_post_ra>
